<compile_context>
chip_gen: v7x
topology: tpu7x:2x2x1
jax: 0.10.0
libtpu: 0.0.40
codegen_flags: <defaults>
</compile_context>

<pallas_src>
import math
from functools import partial

import jax
import jax.numpy as jnp
from jax.experimental import pallas as pl
from jax.experimental.pallas import tpu as pltpu


def _widen_roll_kernel(x_ref, o_ref, *, hp, w, g):
    """Roll/mask path. One grid step = a (R, Wp) 2-D slab.

    Layout: Wp = g*w lanes hold g image rows side by side (g == 1 is the
    natural (rows, W) layout); hp = H // g packed rows per image.  All shifts
    are pltpu.roll (XLU); zero padding is applied with jnp.where against
    boundary predicates built once on (1, Wp) / (R, 1) shapes.
    """
    R, Wp = x_ref.shape
    x = x_ref[...].astype(jnp.float32)

    lane = jax.lax.broadcasted_iota(jnp.int32, (1, Wp), 1)
    col = lane % w                                    # column index within the image
    srow = jax.lax.broadcasted_iota(jnp.int32, (R, 1), 0)
    rloc = srow % hp                                  # packed-row index within the image
    not_bottom = rloc != (hp - 1)
    not_top = rloc != 0

    # ---- horizontal 3-tap sum (zero halo via edge predicates) ----
    if w > 1:
        east = pltpu.roll(x, shift=Wp - 1, axis=1)    # east[l] = x[(l+1) % Wp]
        west = pltpu.roll(x, shift=1, axis=1)         # west[l] = x[(l-1) % Wp]
        h3 = x + jnp.where(col != (w - 1), east, 0.0) + jnp.where(col != 0, west, 0.0)
    else:
        h3 = x

    # ---- vertical 3-tap sum on h3 ----
    if g == 1:
        south = pltpu.roll(h3, shift=R - 1, axis=0)   # south[r] = h3[(r+1) % R]
        north = pltpu.roll(h3, shift=1, axis=0)       # north[r] = h3[(r-1) % R]
        out = h3 + jnp.where(not_bottom, south, 0.0) + jnp.where(not_top, north, 0.0)
    else:
        # g image rows are packed along lanes: image row r+1 is either the next
        # lane block of the same slab row, or (for the last lane block) the
        # first lane block of the next slab row.
        in_last_blk = lane >= (Wp - w)
        in_first_blk = lane < w
        a = pltpu.roll(h3, shift=Wp - w, axis=1)      # a[l]    = h3[(l+w) % Wp]
        a_up = pltpu.roll(a, shift=R - 1, axis=0)     # a_up[r] = a[(r+1) % R]
        south = jnp.where(in_last_blk, jnp.where(not_bottom, a_up, 0.0), a)
        b = pltpu.roll(h3, shift=w, axis=1)           # b[l]    = h3[(l-w) % Wp]
        b_dn = pltpu.roll(b, shift=1, axis=0)         # b_dn[r] = b[(r-1) % R]
        north = jnp.where(in_first_blk, jnp.where(not_top, b_dn, 0.0), b)
        out = h3 + south + north

    # bias == 0 (baked in); torch.clamp(widen, 0.0, 1.0)
    o_ref[...] = jnp.clip(out, 0.0, 1.0).astype(o_ref.dtype)


def _widen_fallback_kernel(x_ref, o_ref):
    """Concat-based path for shapes that cannot be laid out lane/sublane
    aligned (W not packable to a multiple of 128, or too few rows).  Always
    lowers; only taken for small / awkward maps."""
    bt, H, W = x_ref.shape
    x = x_ref[...].astype(jnp.float32)
    if H > 1:
        zrow = jnp.zeros((bt, 1, W), jnp.float32)
        v = x + jnp.concatenate([x[:, 1:, :], zrow], axis=1) \
              + jnp.concatenate([zrow, x[:, :H - 1, :]], axis=1)
    else:
        v = x
    if W > 1:
        zcol = jnp.zeros((bt, H, 1), jnp.float32)
        out = v + jnp.concatenate([v[:, :, 1:], zcol], axis=2) \
                + jnp.concatenate([zcol, v[:, :, :W - 1]], axis=2)
    else:
        out = v
    o_ref[...] = jnp.clip(out, 0.0, 1.0).astype(o_ref.dtype)


def _tpu_generation():
    try:
        kind = jax.devices()[0].device_kind.lower()
    except Exception:
        return 0
    if "v7" in kind or "tpu7" in kind or "7x" in kind:
        return 7
    if "v6" in kind:
        return 6
    if "v5" in kind:
        return 5
    if "v4" in kind:
        return 4
    return 0


def widen_attention(attention):
    """attention: (B, 1, H, W) — same layout as the PyTorch module."""
    B, C, H, W = attention.shape
    assert C == 1, "WidenAttention conv has in_channels=1"
    dtype = attention.dtype
    itemsize = jnp.dtype(dtype).itemsize
    x3 = attention.reshape(B, H, W)             # channel squeeze: no data movement

    gen = _tpu_generation()
    multi_tc = gen >= 7                                   # v7x: 2 TensorCores / chip
    vmem_cap = (64 << 20) if gen >= 7 else (128 << 20)
    # Bigger blocks on single-TC v5e/v6e (1-4+ MiB tiles ~ HBM roofline);
    # ~2 MiB on v7x so both TCs get >= 2 grid steps.
    target_block_bytes = (2 << 20) if multi_tc else (6 << 20)

    # Lane packing: fold g = 128//W image rows side by side along the lane axis
    # (pure reshape) so the output is lane-dense (full vst, no vst.msk stores).
    g = 1
    if 1 < W < 128 and 128 % W == 0 and H % (128 // W) == 0:
        g = 128 // W
    hp = H // g                  # packed rows per image
    Wp = g * W                   # lanes per packed row
    Rtot = B * hp                # total packed rows

    nbytes = B * H * W * itemsize
    cost = pl.CostEstimate(flops=10 * B * H * W, transcendentals=0,
                           bytes_accessed=2 * nbytes)

    use_roll = (Wp % 128 == 0)
    rb = 0
    if use_roll:
        # Rows per block: multiple of hp (never split an image) and of 8
        # (f32 sublane alignment for the sublane rolls).
        step = math.lcm(hp, 8)
        max_rows = (Rtot // step) * step
        if max_rows == 0:
            use_roll = False                       # too few rows for an aligned slab
        else:
            row_bytes = Wp * itemsize
            rb = max(step, min(max_rows,
                               (target_block_bytes // max(1, row_bytes)) // step * step))
            if multi_tc and Rtot >= 2 * step:
                # keep >= 2 grid steps so both v7x TensorCores get work
                rb = min(rb, max(step, ((Rtot // 2) // step) * step))
            # TODO(synk): row-block tiling with a 1-row halo (manual
            # make_async_copy of rb+2 rows from pl.ANY) for huge maps where a
            # whole image + its f32 temporaries exceeds the v7x 64 MiB budget.

    if use_roll:
        x2 = x3.reshape(Rtot, Wp)                  # pure reshape: no data movement
        block_in = rb * Wp * itemsize
        f32_block = rb * Wp * 4
        # double-buffered in+out + ~8 live f32 full-block temporaries + slack
        need = 4 * block_in + 8 * f32_block + (4 << 20)
        vmem_limit = int(min(vmem_cap - (8 << 20), max(32 << 20, need)))
        out2 = pl.pallas_call(
            partial(_widen_roll_kernel, hp=hp, w=W, g=g),
            out_shape=jax.ShapeDtypeStruct((Rtot, Wp), dtype),
            grid=(pl.cdiv(Rtot, rb),),
            in_specs=[pl.BlockSpec((rb, Wp), lambda i: (i, 0))],
            out_specs=pl.BlockSpec((rb, Wp), lambda i: (i, 0)),
            compiler_params=pltpu.CompilerParams(
                # TODO(synk): if an xprof profile shows a single v7x TC doing
                # every step, switch this axis to pltpu.CORE_PARALLEL.
                dimension_semantics=("parallel",),
                vmem_limit_bytes=vmem_limit,
            ),
            cost_estimate=cost,
        )(x2)
        return out2.reshape(B, 1, H, W)

    # ---------- fallback: whole-image 3-D blocks, concat-based shifts ----------
    img_bytes = H * W * itemsize
    bt = max(1, min(B, target_block_bytes // max(1, img_bytes)))
    if multi_tc and B >= 2:
        bt = max(1, min(bt, pl.cdiv(B, 2)))        # only split for the 2-TC chip
    block_in = bt * img_bytes
    need = 4 * block_in + 8 * bt * H * W * 4 + (4 << 20)
    vmem_limit = int(min(vmem_cap - (8 << 20), max(32 << 20, need)))
    out = pl.pallas_call(
        _widen_fallback_kernel,
        out_shape=jax.ShapeDtypeStruct((B, H, W), dtype),
        grid=(pl.cdiv(B, bt),),
        in_specs=[pl.BlockSpec((bt, H, W), lambda i: (i, 0, 0))],
        out_specs=pl.BlockSpec((bt, H, W), lambda i: (i, 0, 0)),
        compiler_params=pltpu.CompilerParams(
            dimension_semantics=("parallel",),
            vmem_limit_bytes=vmem_limit,
        ),
        cost_estimate=cost,
    )(x3)
    return out.reshape(B, 1, H, W)


def _reference(attention):
    """Pure-JAX reference of the PyTorch forward (ones 3x3 conv, bias 0, clamp)."""
    B, C, H, W = attention.shape
    xp = jnp.pad(attention.reshape(B, H, W).astype(jnp.float32),
                 ((0, 0), (1, 1), (1, 1)))
    acc = jnp.zeros((B, H, W), jnp.float32)
    for di in range(3):
        for dj in range(3):
            acc = acc + xp[:, di:di + H, dj:dj + W]
    return jnp.clip(acc, 0.0, 1.0).reshape(B, 1, H, W).astype(attention.dtype)


if __name__ == "__main__":
    key = jax.random.PRNGKey(0)
    k1, k2, k3 = jax.random.split(key, 3)

    # Case 1: tiny map / too few rows for an aligned slab -> concat fallback path.
    a1 = jax.random.uniform(k1, (2, 1, 16, 16), dtype=jnp.float32,
                            minval=-0.2, maxval=0.3)
    o1 = jax.block_until_ready(widen_attention(a1))
    r1 = _reference(a1)
    assert o1.shape == r1.shape == (2, 1, 16, 16)
    assert jnp.allclose(o1, r1, atol=1e-5, rtol=1e-5), "mismatch vs reference (2x16x16)"

    # Case 2: small map, lane-packed roll path (g = 8 image rows per 128-lane slab row).
    a2 = jax.random.uniform(k2, (8, 1, 16, 16), dtype=jnp.float32,
                            minval=-0.2, maxval=0.3)
    o2 = jax.block_until_ready(widen_attention(a2))
    r2 = _reference(a2)
    assert o2.shape == r2.shape == (8, 1, 16, 16)
    assert jnp.allclose(o2, r2, atol=1e-5, rtol=1e-5), "mismatch vs reference (8x16x16)"

    # Case 3: lane-dense map, unpacked roll path (W = 128).
    a3 = jax.random.uniform(k3, (4, 1, 16, 128), dtype=jnp.float32,
                            minval=-0.2, maxval=0.3)
    o3 = jax.block_until_ready(widen_attention(a3))
    r3 = _reference(a3)
    assert o3.shape == r3.shape == (4, 1, 16, 128)
    assert jnp.allclose(o3, r3, atol=1e-5, rtol=1e-5), "mismatch vs reference (4x16x128)"

    print("KERNEL_OK")
</pallas_src>

<mosaic_0001>
module attributes {stable_mosaic.version = 11 : i64} {
  func.func @_widen_fallback_kernel(%arg0: i32, %arg1: memref<2x16x16xf32, #tpu.memory_space<vmem>>, %arg2: memref<2x16x16xf32, #tpu.memory_space<vmem>>) attributes {dimension_semantics = [#tpu.dimension_semantics<parallel>], iteration_bounds = array<i64: 1>, scalar_prefetch = 0 : i64, scratch_operands = 0 : i64, tpu.core_type = #tpu.core_type<tc>, window_params = [{transform_indices = @transform_0, window_bounds = array<i64: 2, 16, 16>}, {transform_indices = @transform_1, window_bounds = array<i64: 2, 16, 16>}]} {
    %c0 = arith.constant 0 : index
    %c0_0 = arith.constant 0 : index
    %c0_1 = arith.constant 0 : index
    %0 = vector.load %arg1[%c0, %c0_0, %c0_1] : memref<2x16x16xf32, #tpu.memory_space<vmem>>, vector<2x16x16xf32>
    %cst = arith.constant 0.000000e+00 : f32
    %1 = vector.broadcast %cst : f32 to vector<2x1x16xf32>
    %2 = vector.extract_strided_slice %0 {offsets = [0, 1, 0], sizes = [2, 15, 16], strides = [1, 1, 1]} : vector<2x16x16xf32> to vector<2x15x16xf32>
    %3 = tpu.concatenate %2, %1 in 1 : vector<2x15x16xf32>, vector<2x1x16xf32> -> vector<2x16x16xf32>
    %4 = arith.addf %0, %3 : vector<2x16x16xf32>
    %5 = vector.extract_strided_slice %0 {offsets = [0, 0, 0], sizes = [2, 15, 16], strides = [1, 1, 1]} : vector<2x16x16xf32> to vector<2x15x16xf32>
    %6 = tpu.concatenate %1, %5 in 1 : vector<2x1x16xf32>, vector<2x15x16xf32> -> vector<2x16x16xf32>
    %7 = arith.addf %4, %6 : vector<2x16x16xf32>
    %cst_2 = arith.constant 0.000000e+00 : f32
    %8 = vector.broadcast %cst_2 : f32 to vector<2x16x1xf32>
    %9 = vector.extract_strided_slice %7 {offsets = [0, 0, 1], sizes = [2, 16, 15], strides = [1, 1, 1]} : vector<2x16x16xf32> to vector<2x16x15xf32>
    %10 = tpu.concatenate %9, %8 in 2 : vector<2x16x15xf32>, vector<2x16x1xf32> -> vector<2x16x16xf32>
    %11 = arith.addf %7, %10 : vector<2x16x16xf32>
    %12 = vector.extract_strided_slice %7 {offsets = [0, 0, 0], sizes = [2, 16, 15], strides = [1, 1, 1]} : vector<2x16x16xf32> to vector<2x16x15xf32>
    %13 = tpu.concatenate %8, %12 in 2 : vector<2x16x1xf32>, vector<2x16x15xf32> -> vector<2x16x16xf32>
    %14 = arith.addf %11, %13 : vector<2x16x16xf32>
    %cst_3 = arith.constant 0.000000e+00 : f32
    %cst_4 = arith.constant 1.000000e+00 : f32
    %15 = vector.broadcast %cst_3 : f32 to vector<2x16x16xf32>
    %16 = arith.maximumf %15, %14 : vector<2x16x16xf32>
    %17 = vector.broadcast %cst_4 : f32 to vector<2x16x16xf32>
    %18 = arith.minimumf %17, %16 : vector<2x16x16xf32>
    %c0_5 = arith.constant 0 : index
    %c0_6 = arith.constant 0 : index
    %c0_7 = arith.constant 0 : index
    %19 = vector.load %arg2[%c0_5, %c0_6, %c0_7] : memref<2x16x16xf32, #tpu.memory_space<vmem>>, vector<2x16x16xf32>
    tpu.vector_store %arg2[%c0_5, %c0_6, %c0_7], %18 {strides = array<i32>} : memref<2x16x16xf32, #tpu.memory_space<vmem>>, vector<2x16x16xf32>,
    return
  }
  func.func @transform_0(%arg0: i32) -> (i32, i32, i32) {
    %c0_i32 = arith.constant 0 : i32
    %c0_i32_0 = arith.constant 0 : i32
    %c0_i32_1 = arith.constant 0 : i32
    return %arg0, %c0_i32, %c0_i32_0 : i32, i32, i32
  }
  func.func @transform_1(%arg0: i32) -> (i32, i32, i32) {
    %c0_i32 = arith.constant 0 : i32
    %c0_i32_0 = arith.constant 0 : i32
    %c0_i32_1 = arith.constant 0 : i32
    return %arg0, %c0_i32, %c0_i32_0 : i32, i32, i32
  }
}

</mosaic_0001>

<bundles_post_ra>
// kernel: tpu_custom_call.1
= control target key start
LH: loop header
LB: loop body
LE: loop exit
PB: predicated region body
PF: predicated region fallthrough
CT: control target
= control target key end

     0   :  { %6 = vsyncpa [#allocation3], 0  ;;  %s257_s0 = inlined_call_operand.hbm [shape: f32[2,16,16], index: 0, kind: input, shape index: {}]   ;;  %s258_s1 = inlined_call_operand.hbm [shape: f32[2,16,16], index: 1, kind: output, shape index: {}]  }
   0x1   :  { %7 = vsyncpa [#allocation4], 0  ;;  %s195_s6 = smov [#allocation2]   ;;  %s147_s10 = scalar_lea.hbm %s257_s0, 512 }
   0x2   :  { %s13_s7 = sshll.u32 %s195_s6, 4  ;;  %p148_p0 = scmp.ne.s32.totalorder %s257_s0, %s147_s10  ;;  %s14_s7 = int_to_ptr.vmem [resolvable:$true] %s13_s7 }
   0x3   :  { %p151_p1 = scmp.lt.u32.totalorder %s147_s10, %s257_s0 }
   0x5   :  { %p153_p2 = pnand %p151_p1, %p148_p0 }
   0x7   :  { %156 = shalt.err (!%p153_p2)
}
   0x8   :  { %s157_s15 = scalar_lea.vmem %s14_s7, 512  ;;  %p162_p4 = scmp.lt.s32.totalorder %s14_s7, %s14_s7 }
   0x9   :  { %p158_p3 = scmp.ne.s32.totalorder %s14_s7, %s157_s15  ;;  %p163_p5 = scmp.lt.s32.totalorder %s157_s15, %s157_s15 }
   0xb   :  { %p164_p6 = por %p163_p5, %p162_p4 }
   0xd   :  { %p165_p7 = pnand %p164_p6, %p158_p3 }
   0xf   :  { %168 = shalt.err (!%p165_p7)
}
  0x10   :  { %s196_s16 = smov 128   ;;  %s197_s17 = smov 8  }
  0x11   :  { %19 = dma.hbm_to_vmem [thread:$0]  %s257_s0, 512, %s14_s7, [#allocation3], %s196_s16, %s196_s16, %s197_s17  }
  0x12   :  { %191 = dma.done.wait [#allocation3], 512  }
  0x13   :  { %192 = vsyncadd [#allocation3], 4294966784  ;;  %v25_v0 = vld [vmem:[#allocation2 + $0x10] sm:$0xff]  ;;  %v26_v1 = vld [vmem:[#allocation2 + $0x18] sm:$0xff]  ;;  %vm31_vm0 = vcmask 1046528   ;;  %vm48_vm1 = vcmask 1040384  }
  0x14   :  { %v23_v2 = vld [vmem:[#allocation2] sm:$0xff]  ;;  %v35_v3 = vrot.slane %v25_v0, 1  ;;  %v36_v4 = vrot.slane %v26_v1, 1  ;;  %v52_v5 = vrot.slane %v25_v0, 7  ;;  %v24_v6 = vld [vmem:[#allocation2 + $0x8] sm:$0xff]  ;;  %v53_v10 = vrot.slane %v26_v1, 7 }
  0x15   :  { %v32_v7 = vrot.slane %v23_v2, 1  ;;  %v33_v8 = vrot.slane %v24_v6, 1  ;;  %v49_v9 = vrot.slane %v23_v2, 7  ;;  %v50_v11 = vrot.slane %v24_v6, 7  ;;  %s198_s0 = smov 127   ;;  %s199_s20 = smov 1  }
  0x16   :  { %v37_v12 = vsel %vm31_vm0, %v35_v3, %v36_v4  ;;  %v60_v13 = vsel %vm48_vm1, 0.0, %v52_v5  ;;  %v43_v14 = vsel %vm31_vm0, %v36_v4, 0.0  ;;  %v54_v20 = vsel %vm48_vm1, %v52_v5, %v53_v10  ;;  %s200_s21 = smov [#allocation5]  }
  0x17   :  { %v46_v15 = vadd.f32 %v37_v12, %v25_v0  ;;  %v34_v16 = vsel %vm31_vm0, %v32_v7, %v33_v8  ;;  %v59_v17 = vsel %vm48_vm1, 0.0, %v49_v9  ;;  %v47_v18 = vadd.f32 %v43_v14, %v26_v1  ;;  %s129_s22 = sshll.u32 %s200_s21, 4  ;;  %s130_s22 = int_to_ptr.vmem [resolvable:$true] %s129_s22 }
  0x18   :  { %v44_v19 = vadd.f32 %v34_v16, %v23_v2  ;;  %v42_v21 = vsel %vm31_vm0, %v33_v8, 0.0  ;;  %v51_v24 = vsel %vm48_vm1, %v49_v9, %v50_v11  ;;  %vm81_vm2 = vcmask 121856   ;;  %s169_s23 = scalar_lea.vmem %s130_s22, 512  ;;  %p174_p9 = scmp.lt.s32.totalorder %s130_s22, %s130_s22 }
  0x19   :  { %v63_v22 = vadd.f32 %v60_v13, %v46_v15  ;;  %v45_v23 = vadd.f32 %v42_v21, %v24_v6  ;;  %v64_v26 = vadd.f32 %v54_v20, %v47_v18  ;;  %vm102_vm3 = vcmask 7168   ;;  %p170_p8 = scmp.ne.s32.totalorder %s130_s22, %s169_s23  ;;  %p175_p10 = scmp.lt.s32.totalorder %s169_s23, %s169_s23 }
  0x1a   :  { %v61_v25 = vadd.f32 %v59_v17, %v44_v19  ;;  %vm119_vm4 = vcmask 130048  }
  0x1b   :  { %73 = vrot.lane.b32.xlu1 %v63_v22, %s198_s0  ;;  %v62_v27 = vadd.f32 %v51_v24, %v45_v23  ;;  %p176_p11 = por %p175_p10, %p174_p9 }
  0x1c   :  { %69 = vrot.lane.b32.xlu0 %v61_v25, %s198_s0 }
  0x1d   :  { %p177_p12 = pnand %p176_p11, %p170_p8 }
  0x1f   :  { %75 = vrot.lane.b32.xlu1 %v64_v26, %s198_s0 }
  0x20   :  { %71 = vrot.lane.b32.xlu0 %v62_v27, %s198_s0 }
  0x23   :  { %92 = vrot.lane.b32.xlu1 %v62_v27, %s199_s20 }
  0x24   :  { %90 = vrot.lane.b32.xlu0 %v61_v25, %s199_s20 }
  0x27   :  { %96 = vrot.lane.b32.xlu1 %v64_v26, %s199_s20 }
  0x28   :  { %94 = vrot.lane.b32.xlu0 %v63_v22, %s199_s20 }
  0x8d   :  { %v74_v28 = vpop.permute.xlu1 %73 }
  0x8e   :  { %v70_v29 = vpop.permute.xlu0 %69  ;;  %v84_v40 = vsel %vm81_vm2, %v74_v28, 0.0 }
  0x8f   :  { %v82_v32 = vsel %vm81_vm2, %v70_v29, 0.0  ;;  %v88_v47 = vadd.f32 %v84_v40, %v63_v22 }
  0x90   :  { %v86_v36 = vadd.f32 %v82_v32, %v61_v25 }
  0x91   :  { %v76_v30 = vpop.permute.xlu1 %75 }
  0x92   :  { %v72_v31 = vpop.permute.xlu0 %71  ;;  %v85_v37 = vsel %vm81_vm2, %v76_v30, 0.0 }
  0x93   :  { %v83_v33 = vsel %vm81_vm2, %v72_v31, 0.0  ;;  %v89_v44 = vadd.f32 %v85_v37, %v64_v26 }
  0x94   :  { %v87_v34 = vadd.f32 %v83_v33, %v62_v27 }
  0x95   :  { %v93_v35 = vpop.permute.xlu1 %92 }
  0x96   :  { %v104_v38 = vsel %vm102_vm3, 0.0, %v93_v35  ;;  %v91_v39 = vpop.permute.xlu0 %90 }
  0x97   :  { %v108_v41 = vadd.f32 %v104_v38, %v87_v34  ;;  %v103_v42 = vsel %vm102_vm3, 0.0, %v91_v39 }
  0x98   :  { %v107_v43 = vadd.f32 %v103_v42, %v86_v36 }
  0x99   :  { %v112_v45 = vmax.f32 %v108_v41, 0.0  ;;  %v97_v46 = vpop.permute.xlu1 %96 }
  0x9a   :  { %v111_v48 = vmax.f32 %v107_v43, 0.0  ;;  %v106_v49 = vsel %vm102_vm3, 0.0, %v97_v46  ;;  %v95_v50 = vpop.permute.xlu0 %94 }
  0x9b   :  { %v116_v51 = vmin.f32 %v112_v45, 1.0  ;;  %v110_v52 = vadd.f32 %v106_v49, %v89_v44  ;;  %v105_v53 = vsel %vm102_vm3, 0.0, %v95_v50 }
  0x9c   :  { %v115_v54 = vmin.f32 %v111_v48, 1.0  ;;  %v109_v55 = vadd.f32 %v105_v53, %v88_v47 }
  0x9d   :  { %121 = vst.msk [vmem:[#allocation5 + $0x8] sm:$0xff] %vm119_vm4, %v116_v51  ;;  %v114_v56 = vmax.f32 %v110_v52, 0.0 }
  0x9e   :  { %120 = vst.msk [vmem:[#allocation5] sm:$0xff] %vm119_vm4, %v115_v54  ;;  %v113_v57 = vmax.f32 %v109_v55, 0.0 }
  0x9f   :  { %v118_v58 = vmin.f32 %v114_v56, 1.0 }
  0xa0   :  { %v117_v59 = vmin.f32 %v113_v57, 1.0 }
  0xa1   :  { %123 = vst.msk [vmem:[#allocation5 + $0x18] sm:$0xff] %vm119_vm4, %v118_v58 }
  0xa2   :  { %122 = vst.msk [vmem:[#allocation5 + $0x10] sm:$0xff] %vm119_vm4, %v117_v59 }
  0xa3   :  { %180 = shalt.err (!%p177_p12)
}
  0xa4   :  { %s181_s26 = scalar_lea.hbm %s258_s1, 512 }
  0xa5   :  { %p182_p13 = scmp.ne.s32.totalorder %s258_s1, %s181_s26  ;;  %p185_p0 = scmp.lt.u32.totalorder %s181_s26, %s258_s1 }
  0xa7   :  { %p187_p1 = pnand %p185_p0, %p182_p13 }
  0xa9   :  { %190 = shalt.err (!%p187_p1)
}
  0xaa   :  { %135 = dma.vmem_to_hbm [thread:$0]  %s130_s22, 512, %s258_s1, [#allocation4], %s196_s16, %s196_s16, %s197_s17  }
  0xab   :  { %193 = dma.done.wait [#allocation4], 512  }
  0xac   :  { %194 = vsyncadd [#allocation4], 4294966784 }
  0xad   :  { %139 = vsyncpa [#allocation3], 1 }
  0xae   :  { %140 = vsyncpa [#allocation4], 1 }

</bundles_post_ra>
